<compile_context>
chip_gen: v6e
topology: v6e:2x2x1
jax: 0.10.0
libtpu: 0.0.40
codegen_flags: <defaults>
</compile_context>

<pallas_src>
import functools

import numpy as np
import jax
import jax.numpy as jnp
from jax import lax
from jax.experimental import pallas as pl
from jax.experimental.pallas import tpu as pltpu

EPS = 1e-4          # BatchNorm1d eps from Linear_BN_leakyReLU
NEG_SLOPE = 0.01    # F.leaky_relu default negative_slope
LANE = 128
ROW_TILE = 128      # batch-tile (MXU row height); 256 also fine on v6e/v7x


def _fused_mlp_kernel(*refs, n_valid):
    """refs = (x_ref, w_hidden_1, ..., w_hidden_n, w_code_padded, o_ref).

    One grid step = one independent batch (zero-padded to ROW_TILE rows).
    `n_valid` (static) is the true batch size; padded rows are masked out of the
    BatchNorm statistics and their divisor is `n_valid`.
    """
    x_ref = refs[0]
    w_refs = refs[1:-1]
    o_ref = refs[-1]

    h = x_ref[...].astype(jnp.float32)                       # (R, x_dim)
    rows = lax.broadcasted_iota(jnp.int32, (h.shape[0], 1), 0)
    mask = (rows < n_valid).astype(jnp.float32)              # (R, 1)
    inv_n = jnp.float32(1.0 / n_valid)

    for w_ref in w_refs[:-1]:
        z = jnp.dot(h, w_ref[...], preferred_element_type=jnp.float32)   # (R, out)
        mean = jnp.sum(z * mask, axis=0, keepdims=True) * inv_n          # batch mean
        d = z - mean
        var = jnp.sum((d * d) * mask, axis=0, keepdims=True) * inv_n     # biased var
        y = d * lax.rsqrt(var + EPS)
        h = jnp.maximum(y, NEG_SLOPE * y)                                # LeakyReLU

    # final code layer (output columns zero-padded to a lane-dense width)
    o_ref[...] = jnp.dot(h, w_refs[-1][...],
                         preferred_element_type=jnp.float32).astype(o_ref.dtype)


def fused_mlp_call(x_groups, weights, n_valid):
    """x_groups: (G, ROW_TILE, x_dim) zero-padded batches; weights: list of (in, out).

    Single pallas_call, grid over the G independent batches; weights are fetched
    once (constant index_map) and stay VMEM-resident across the grid.
    """
    G, R, x_dim = x_groups.shape
    out_pad = weights[-1].shape[1]
    x2 = x_groups.reshape(G * R, x_dim)

    in_specs = [pl.BlockSpec((R, x_dim), lambda g: (g, 0))]
    for w in weights:
        in_specs.append(pl.BlockSpec(w.shape, lambda g: (0, 0)))  # constant -> resident

    flops = 2 * G * R * sum(int(w.shape[0]) * int(w.shape[1]) for w in weights)
    transcendentals = G * sum(int(w.shape[1]) for w in weights[:-1])   # one rsqrt / channel
    bytes_accessed = 4 * (x2.size + sum(int(w.size) for w in weights) + G * R * out_pad)

    out = pl.pallas_call(
        functools.partial(_fused_mlp_kernel, n_valid=n_valid),
        out_shape=jax.ShapeDtypeStruct((G * R, out_pad), jnp.float32),
        grid=(G,),
        in_specs=in_specs,
        out_specs=pl.BlockSpec((R, out_pad), lambda g: (g, 0)),
        compiler_params=pltpu.CompilerParams(dimension_semantics=("parallel",)),
        cost_estimate=pl.CostEstimate(flops=flops,
                                      transcendentals=transcendentals,
                                      bytes_accessed=bytes_accessed),
    )(x2, *weights)
    return out.reshape(G, R, out_pad)


def init_mlp_params(key, x_dim, h_dims=(128, 64), rep_dim=32):
    """Deterministic synthetic weights, stored as (in, out); code weight zero-padded
    to a multiple-of-128 output width for lane-dense stores."""
    dims = [x_dim, *h_dims]
    hidden = []
    for i in range(1, len(dims)):
        key, sub = jax.random.split(key)
        w = jax.random.normal(sub, (dims[i - 1], dims[i]), jnp.float32)
        hidden.append(w / jnp.sqrt(jnp.float32(dims[i - 1])))
    key, sub = jax.random.split(key)
    wc = jax.random.normal(sub, (h_dims[-1], rep_dim), jnp.float32)
    wc = wc / jnp.sqrt(jnp.float32(h_dims[-1]))
    rep_pad = ((rep_dim + LANE - 1) // LANE) * LANE
    wc_pad = jnp.zeros((h_dims[-1], rep_pad), jnp.float32).at[:, :rep_dim].set(wc)
    return {"hidden": tuple(hidden), "code": wc_pad}


@jax.jit
def mlp_forward(x, hidden_ws, code_w_padded):
    """x: (G, B, *feature_dims) = G independent batches of size B (each batch gets its
    own BatchNorm statistics, exactly like one PyTorch forward per batch).

    Returns the lane-dense padded code output (G, ROW_TILE, rep_pad); keep it padded
    downstream (zero-pad the DeepSAD center) or use extract_code() for the
    (G, B, rep_dim) view.
    """
    G, B = x.shape[0], x.shape[1]
    h = x.reshape(G, B, -1).astype(jnp.float32)
    row_tile = max(ROW_TILE, -(-B // 8) * 8)          # pad rows to >= MXU tile height
    h_pad = jnp.pad(h, ((0, 0), (0, row_tile - B), (0, 0)))
    weights = (*hidden_ws, code_w_padded)
    return fused_mlp_call(h_pad, list(weights), n_valid=B)


def extract_code(out_padded, batch, rep_dim):
    """Slice the (G, ROW_TILE, rep_pad) padded output back to (G, batch, rep_dim)."""
    return out_padded[:, :batch, :rep_dim]


@jax.jit
def _reference_forward(x, hidden_ws, code_w_padded):
    """Pure-JAX reference with the exact PyTorch forward semantics (per-batch BN)."""
    G, B = x.shape[0], x.shape[1]
    h = x.reshape(G, B, -1).astype(jnp.float32)
    for w in hidden_ws:
        z = jnp.einsum("gbi,io->gbo", h, w)
        mean = jnp.mean(z, axis=1, keepdims=True)
        var = jnp.mean((z - mean) ** 2, axis=1, keepdims=True)
        y = (z - mean) / jnp.sqrt(var + EPS)
        h = jnp.where(y >= 0, y, NEG_SLOPE * y)
    return jnp.einsum("gbi,io->gbo", h, code_w_padded)


if __name__ == "__main__":
    key = jax.random.PRNGKey(0)
    k_x, k_p = jax.random.split(key)

    # 4 independent batches of 8 samples, each sample (4, 16) -> x_dim = 64
    G, B, C, T = 4, 8, 4, 16
    x = jax.random.normal(k_x, (G, B, C, T), jnp.float32)

    x_dim = C * T
    rep_dim = 32
    params = init_mlp_params(k_p, x_dim, h_dims=(128, 64), rep_dim=rep_dim)

    out_padded = mlp_forward(x, params["hidden"], params["code"])
    jax.block_until_ready(out_padded)
    assert out_padded.shape == (G, ROW_TILE, LANE) and out_padded.dtype == jnp.float32

    code = extract_code(out_padded, B, rep_dim)
    assert code.shape == (G, B, rep_dim)

    # padded columns of valid rows must be exactly zero (zero-padded code weight)
    assert float(jnp.max(jnp.abs(out_padded[:, :B, rep_dim:]))) == 0.0

    # numerical parity with the pure-JAX (PyTorch-semantics) reference
    ref = _reference_forward(x, params["hidden"], params["code"])[:, :, :rep_dim]
    assert np.allclose(np.asarray(code), np.asarray(ref), atol=2e-3, rtol=2e-3)

    print("KERNEL_OK")
</pallas_src>

<mosaic_0001>
module attributes {stable_mosaic.version = 11 : i64} {
  func.func @_fused_mlp_kernel(%arg0: i32, %arg1: memref<128x64xf32, #tpu.memory_space<vmem>>, %arg2: memref<64x128xf32, #tpu.memory_space<vmem>>, %arg3: memref<128x64xf32, #tpu.memory_space<vmem>>, %arg4: memref<64x128xf32, #tpu.memory_space<vmem>>, %arg5: memref<128x128xf32, #tpu.memory_space<vmem>>) attributes {dimension_semantics = [#tpu.dimension_semantics<parallel>], iteration_bounds = array<i64: 4>, scalar_prefetch = 0 : i64, scratch_operands = 0 : i64, tpu.core_type = #tpu.core_type<tc>, window_params = [{transform_indices = @transform_0, window_bounds = array<i64: 128, 64>}, {pipeline_mode = #tpu.pipeline_mode<synchronous>, transform_indices = @transform_1, window_bounds = array<i64: 64, 128>}, {pipeline_mode = #tpu.pipeline_mode<synchronous>, transform_indices = @transform_2, window_bounds = array<i64: 128, 64>}, {pipeline_mode = #tpu.pipeline_mode<synchronous>, transform_indices = @transform_3, window_bounds = array<i64: 64, 128>}, {transform_indices = @transform_4, window_bounds = array<i64: 128, 128>}]} {
    %c0 = arith.constant 0 : index
    %c0_0 = arith.constant 0 : index
    %0 = vector.load %arg1[%c0, %c0_0] : memref<128x64xf32, #tpu.memory_space<vmem>>, vector<128x64xf32>
    %1 = tpu.iota {dimensions = array<i32: 0>} : vector<128x1xi32>
    %c8_i32 = arith.constant 8 : i32
    %2 = vector.broadcast %c8_i32 : i32 to vector<128x1xi32>
    %3 = arith.cmpi slt, %1, %2 : vector<128x1xi32>
    %4 = arith.extui %3 : vector<128x1xi1> to vector<128x1xi32>
    %5 = arith.sitofp %4 : vector<128x1xi32> to vector<128x1xf32>
    %c0_1 = arith.constant 0 : index
    %c0_2 = arith.constant 0 : index
    %6 = vector.load %arg2[%c0_1, %c0_2] : memref<64x128xf32, #tpu.memory_space<vmem>>, vector<64x128xf32>
    %cst = arith.constant dense<0.000000e+00> : vector<128x128xf32>
    %7 = tpu.matmul %0, %6, %cst {dimension_numbers = #tpu.dot_dimension_numbers<[1], [0], [0], [1], [0, 0, 1, 1], [], []>} : vector<128x64xf32>, vector<64x128xf32>, vector<128x128xf32> -> vector<128x128xf32>
    %8 = vector.broadcast %5 : vector<128x1xf32> to vector<128x128xf32>
    %9 = arith.mulf %7, %8 : vector<128x128xf32>
    %cst_3 = arith.constant dense<0.000000e+00> : vector<128xf32>
    %10 = vector.multi_reduction <add>, %9, %cst_3 [0] : vector<128x128xf32> to vector<128xf32>
    %11 = vector.shape_cast %10 : vector<128xf32> to vector<1x128xf32>
    %cst_4 = arith.constant 1.250000e-01 : f32
    %12 = vector.broadcast %cst_4 : f32 to vector<1x128xf32>
    %13 = arith.mulf %11, %12 : vector<1x128xf32>
    %14 = vector.broadcast %13 : vector<1x128xf32> to vector<128x128xf32>
    %15 = arith.subf %7, %14 : vector<128x128xf32>
    %16 = arith.mulf %15, %15 : vector<128x128xf32>
    %17 = vector.broadcast %5 : vector<128x1xf32> to vector<128x128xf32>
    %18 = arith.mulf %16, %17 : vector<128x128xf32>
    %cst_5 = arith.constant dense<0.000000e+00> : vector<128xf32>
    %19 = vector.multi_reduction <add>, %18, %cst_5 [0] : vector<128x128xf32> to vector<128xf32>
    %20 = vector.shape_cast %19 : vector<128xf32> to vector<1x128xf32>
    %cst_6 = arith.constant 1.250000e-01 : f32
    %21 = vector.broadcast %cst_6 : f32 to vector<1x128xf32>
    %22 = arith.mulf %20, %21 : vector<1x128xf32>
    %cst_7 = arith.constant 9.99999974E-5 : f32
    %23 = vector.broadcast %cst_7 : f32 to vector<1x128xf32>
    %24 = arith.addf %22, %23 : vector<1x128xf32>
    %25 = math.rsqrt %24 : vector<1x128xf32>
    %26 = vector.broadcast %25 : vector<1x128xf32> to vector<128x128xf32>
    %27 = arith.mulf %15, %26 : vector<128x128xf32>
    %cst_8 = arith.constant 0.00999999977 : f32
    %28 = vector.broadcast %cst_8 : f32 to vector<128x128xf32>
    %29 = arith.mulf %28, %27 : vector<128x128xf32>
    %30 = arith.maximumf %27, %29 : vector<128x128xf32>
    %c0_9 = arith.constant 0 : index
    %c0_10 = arith.constant 0 : index
    %31 = vector.load %arg3[%c0_9, %c0_10] : memref<128x64xf32, #tpu.memory_space<vmem>>, vector<128x64xf32>
    %cst_11 = arith.constant dense<0.000000e+00> : vector<128x64xf32>
    %32 = tpu.matmul %30, %31, %cst_11 {dimension_numbers = #tpu.dot_dimension_numbers<[1], [0], [0], [1], [0, 0, 1, 1], [], []>} : vector<128x128xf32>, vector<128x64xf32>, vector<128x64xf32> -> vector<128x64xf32>
    %33 = vector.broadcast %5 : vector<128x1xf32> to vector<128x64xf32>
    %34 = arith.mulf %32, %33 : vector<128x64xf32>
    %cst_12 = arith.constant dense<0.000000e+00> : vector<64xf32>
    %35 = vector.multi_reduction <add>, %34, %cst_12 [0] : vector<128x64xf32> to vector<64xf32>
    %36 = vector.shape_cast %35 : vector<64xf32> to vector<1x64xf32>
    %cst_13 = arith.constant 1.250000e-01 : f32
    %37 = vector.broadcast %cst_13 : f32 to vector<1x64xf32>
    %38 = arith.mulf %36, %37 : vector<1x64xf32>
    %39 = vector.broadcast %38 : vector<1x64xf32> to vector<128x64xf32>
    %40 = arith.subf %32, %39 : vector<128x64xf32>
    %41 = arith.mulf %40, %40 : vector<128x64xf32>
    %42 = vector.broadcast %5 : vector<128x1xf32> to vector<128x64xf32>
    %43 = arith.mulf %41, %42 : vector<128x64xf32>
    %cst_14 = arith.constant dense<0.000000e+00> : vector<64xf32>
    %44 = vector.multi_reduction <add>, %43, %cst_14 [0] : vector<128x64xf32> to vector<64xf32>
    %45 = vector.shape_cast %44 : vector<64xf32> to vector<1x64xf32>
    %cst_15 = arith.constant 1.250000e-01 : f32
    %46 = vector.broadcast %cst_15 : f32 to vector<1x64xf32>
    %47 = arith.mulf %45, %46 : vector<1x64xf32>
    %cst_16 = arith.constant 9.99999974E-5 : f32
    %48 = vector.broadcast %cst_16 : f32 to vector<1x64xf32>
    %49 = arith.addf %47, %48 : vector<1x64xf32>
    %50 = math.rsqrt %49 : vector<1x64xf32>
    %51 = vector.broadcast %50 : vector<1x64xf32> to vector<128x64xf32>
    %52 = arith.mulf %40, %51 : vector<128x64xf32>
    %cst_17 = arith.constant 0.00999999977 : f32
    %53 = vector.broadcast %cst_17 : f32 to vector<128x64xf32>
    %54 = arith.mulf %53, %52 : vector<128x64xf32>
    %55 = arith.maximumf %52, %54 : vector<128x64xf32>
    %c0_18 = arith.constant 0 : index
    %c0_19 = arith.constant 0 : index
    %56 = vector.load %arg4[%c0_18, %c0_19] : memref<64x128xf32, #tpu.memory_space<vmem>>, vector<64x128xf32>
    %cst_20 = arith.constant dense<0.000000e+00> : vector<128x128xf32>
    %57 = tpu.matmul %55, %56, %cst_20 {dimension_numbers = #tpu.dot_dimension_numbers<[1], [0], [0], [1], [0, 0, 1, 1], [], []>} : vector<128x64xf32>, vector<64x128xf32>, vector<128x128xf32> -> vector<128x128xf32>
    %c0_21 = arith.constant 0 : index
    %c0_22 = arith.constant 0 : index
    %58 = vector.load %arg5[%c0_21, %c0_22] : memref<128x128xf32, #tpu.memory_space<vmem>>, vector<128x128xf32>
    tpu.vector_store %arg5[%c0_21, %c0_22], %57 {strides = array<i32>} : memref<128x128xf32, #tpu.memory_space<vmem>>, vector<128x128xf32>,
    return
  }
  func.func @transform_0(%arg0: i32) -> (i32, i32) {
    %c0_i32 = arith.constant 0 : i32
    %c0_i32_0 = arith.constant 0 : i32
    return %arg0, %c0_i32 : i32, i32
  }
  func.func @transform_1(%arg0: i32) -> (i32, i32) {
    %c0_i32 = arith.constant 0 : i32
    %c0_i32_0 = arith.constant 0 : i32
    %c0_i32_1 = arith.constant 0 : i32
    return %c0_i32, %c0_i32_0 : i32, i32
  }
  func.func @transform_2(%arg0: i32) -> (i32, i32) {
    %c0_i32 = arith.constant 0 : i32
    %c0_i32_0 = arith.constant 0 : i32
    %c0_i32_1 = arith.constant 0 : i32
    return %c0_i32, %c0_i32_0 : i32, i32
  }
  func.func @transform_3(%arg0: i32) -> (i32, i32) {
    %c0_i32 = arith.constant 0 : i32
    %c0_i32_0 = arith.constant 0 : i32
    %c0_i32_1 = arith.constant 0 : i32
    return %c0_i32, %c0_i32_0 : i32, i32
  }
  func.func @transform_4(%arg0: i32) -> (i32, i32) {
    %c0_i32 = arith.constant 0 : i32
    %c0_i32_0 = arith.constant 0 : i32
    return %arg0, %c0_i32 : i32, i32
  }
}

</mosaic_0001>

<bundles_post_ra>
// kernel: mlp_forward.1
= control target key start
LH: loop header
LB: loop body
LE: loop exit
PB: predicated region body
PF: predicated region fallthrough
CT: control target
= control target key end

     0   :  { %9 = vsyncpa [#allocation3], 0  ;;  %s2190_s0 = inlined_call_operand.vmem [shape: f32[512,64], index: 0, kind: input, shape index: {}]   ;;  %s2191_s1 = inlined_call_operand.vmem [shape: f32[64,128], index: 1, kind: input, shape index: {}]   ;;  %s2192_s2 = inlined_call_operand.vmem [shape: f32[128,64], index: 2, kind: input, shape index: {}]   ;;  %s2193_s3 = inlined_call_operand.vmem [shape: f32[64,128], index: 3, kind: input, shape index: {}]   ;;  %s2194_s4 = inlined_call_operand.hbm [shape: f32[512,128], index: 4, kind: output, shape index: {}]  }
   0x1   :  { %11 = vsyncpa [#allocation3 + $0x1], 0  ;;  %s1696_s15 = smov 0   ;;  %s1698_s16 = smov 0  }
   0x2   :  { %s1700_s17 = smov 0   ;;  %s1702_s18 = smov 0  }
   0x3 LB: > { %s1717_s19 = sadd.s32 4294967295, %s1666_s18   ;;  %s1284_s20 = sadd.s32 4294967294, %s1666_s18   ;;  %s1666_s18 = sphi %s1702_s18, %s2200_s18   ;;  %s1662_s17 = sphi %s1700_s17, %s2199_s17   ;;  %s1658_s16 = sphi %s1698_s16, %s2198_s16   ;;  %s1654_s15 = sphi %s1696_s15, %s2197_s15  }
   0x4   : > { %s1721_s21 = sadd.s32 1, %s1666_s18   ;;  %s113_s22 = sadd.s32 1, %s1662_s17 }
   0x5   : > { %s110_s23 = ssub.s32 %s1666_s18, %s1721_s21  ;;  %p123_p0 = scmp.ne.s32.totalorder %s1662_s17, %s1658_s16 }
   0x6   : > { %p111_p1 = scmp.eq.s32.totalorder %s110_s23, 0  ;;  %p124_p2 = scmp.eq.s32.totalorder %s1717_s19, 3 }
   0x7   : > { %p129_p3 = scmp.ne.s32.totalorder %s1658_s16, %s1654_s15  ;;  %p130_p4 = scmp.eq.s32.totalorder %s1284_s20, 3 }
   0x8   : > { %s1732_s24 = scalar_select %p111_p1, %s1662_s17, %s113_s22  }
   0x9   : > { %p1734_p5 = por %p124_p2, %p123_p0  ;;  %p1738_p6 = por %p130_p4, %p129_p3 }
   0xa   : > { %p1287_p7 = scmp.ge.s32.totalorder %s1666_s18, 1  ;;  %p166_p8 = scmp.lt.s32.totalorder %s1666_s18, 5 }
   0xc   : > { %p167_p9 = pnand %p1287_p7, %p166_p8 }
   0xd   : > { %s1289_s5 = sshll.u32 (!%p167_p9), %s1717_s19, 4  ;;  %s189_s28 = sand.u32 (!%p167_p9), 1, %s1658_s16  }
   0xe   : > { %170 = sbr.rel (%p167_p9) target bundleno = 899 (0x383), region = 36  ;;  %p193_p10 = scmp.lt.s32.totalorder (!%p167_p9), %s1289_s5, 63 }
   0xf   : > { %s1288_s29 = sshll.u32 (!%p167_p9), %s189_s28, 7  ;;  %s1668_s11 = smov (!%p167_p9), [#allocation2]  }
  0x10   : > { %s2121_s30 = scalar_lea.vmem (!%p167_p9), [#allocation2], %s1288_s29  ;;  %s1610_s12 = sshll.u32 (!%p167_p9), %s1668_s11, 4  ;;  %s1611_s12 = int_to_ptr.vmem [resolvable:$false] %s1610_s12 }
  0x11   : > { %s1222_s6 = sshll.u32 (!%p167_p9), %s2121_s30, 4  ;;  %s1612_s13 = scalar_lea.vmem (!%p167_p9), %s1611_s12, 4096  ;;  %s2144_s6 = int_to_ptr.vmem [resolvable:$true] %s1222_s6 }
  0x12   : > { %p1613_p0 = scmp.lt.s32.totalorder (!%p167_p9), %s2144_s6, %s1611_s12 }
  0x13   : > { %v287_v0 = vld [vmem:[%s2191_s1 + $0x38] sm:$0xff]  ;;  %v286_v1 = vld [vmem:[%s2191_s1 + $0x30] sm:$0xff]  ;;  %v285_v2 = vld [vmem:[%s2191_s1 + $0x28] sm:$0xff]  ;;  %s2202_s5 = smov (!%p193_p10, %s1289_s5), 63  ;;  %vm288_vm0 = vcmask 523264  }
  0x14   : > { %1409 = vmatprep.subr.mxu0 %v287_v0  ;;  %v284_v3 = vld [vmem:[%s2191_s1 + $0x20] sm:$0xff]  ;;  %s1290_s10 = sshll.u32 %s2202_s5, 3  ;;  %v283_v4 = vld [vmem:[%s2191_s1 + $0x18] sm:$0xff]  ;;  %v282_v6 = vld [vmem:[%s2191_s1 + $0x10] sm:$0xff]  ;;  %s1328_s5 = sshll.u32 %s1717_s19, 11 }
  0x15   : > { %1410 = vmatpush3.msra.mxu0 %v287_v0  ;;  %s1763_s20 = scalar_lea.vmem %s2190_s0, %s1290_s10  ;;  %v281_v7 = vld [vmem:[%s2191_s1 + $0x8] sm:$0xff]  ;;  %v280_v8 = vld [vmem:[%s2191_s1] sm:$0xff]  ;;  %v655_v24 = vld [vmem:[%s2192_s2 + $0x78] sm:$0xff]  ;;  %s2142_s9 = scalar_lea.hbm %s2194_s4, %s1328_s5 }
  0x16   : > { %1411 = vmatprep.subr.mxu0 %v286_v1  ;;  %v199_v5 = vld [vmem:[%s1763_s20] sm:$0xff]  ;;  %v200_v9 = vld [vmem:[%s1763_s20 + $0x8] sm:$0xff]  ;;  %v201_v10 = vld [vmem:[%s1763_s20 + $0x10] sm:$0xff]  ;;  %1449 = vmatprep.subr.mxu1 %v655_v24  ;;  %s2150_s10 = scalar_lea.sflag [#allocation3], %s189_s28  ;;  %s1606_s19 = scalar_lea.vmem %s2144_s6, 2048 }
  0x17   : > { %1412 = vmatpush3.msra.mxu0 %v286_v1  ;;  %1425 = vmatprep.mubr.msk.f32.mxu0 %vm288_vm0, %v199_v5  ;;  %v202_v11 = vld [vmem:[%s1763_s20 + $0x18] sm:$0xff]  ;;  %v203_v12 = vld [vmem:[%s1763_s20 + $0x20] sm:$0xff]  ;;  %v204_v13 = vld [vmem:[%s1763_s20 + $0x28] sm:$0xff]  ;;  %p1607_p11 = scmp.ne.s32.totalorder %s2144_s6, %s1606_s19  ;;  %p1614_p1 = scmp.lt.s32.totalorder %s1612_s13, %s1606_s19 }
  0x18   : > { %1413 = vmatprep.subr.mxu0 %v285_v2  ;;  %v205_v14 = vld [vmem:[%s1763_s20 + $0x30] sm:$0xff]  ;;  %v206_v15 = vld [vmem:[%s1763_s20 + $0x38] sm:$0xff]  ;;  %v207_v16 = vld [vmem:[%s1763_s20 + $0x40] sm:$0xff]  ;;  %1450 = vmatpush3.msra.mxu1 %v655_v24 }
  0x19   : > { %1414 = vmatpush3.msra.mxu0 %v285_v2  ;;  %v208_v17 = vld [vmem:[%s1763_s20 + $0x48] sm:$0xff]  ;;  %v209_v18 = vld [vmem:[%s1763_s20 + $0x50] sm:$0xff]  ;;  %v210_v19 = vld [vmem:[%s1763_s20 + $0x58] sm:$0xff]  ;;  %p1608_p12 = pnand %p1607_p11, %p1734_p5  ;;  %p1615_p2 = por %p1614_p1, %p1613_p0 }
  0x1a   : > { %1415 = vmatprep.subr.mxu0 %v284_v3  ;;  %v211_v20 = vld [vmem:[%s1763_s20 + $0x60] sm:$0xff]  ;;  %v212_v21 = vld [vmem:[%s1763_s20 + $0x68] sm:$0xff]  ;;  %v213_v22 = vld [vmem:[%s1763_s20 + $0x70] sm:$0xff] }
  0x1b   : > { %1416 = vmatpush3.msra.mxu0 %v284_v3  ;;  %v214_v23 = vld [vmem:[%s1763_s20 + $0x78] sm:$0xff]  ;;  %v654_v25 = vld [vmem:[%s2192_s2 + $0x70] sm:$0xff]  ;;  %v653_v26 = vld [vmem:[%s2192_s2 + $0x68] sm:$0xff]  ;;  %p1609_p13 = pneg %p1608_p12 }
  0x1c   : > { %1417 = vmatprep.subr.mxu0 %v283_v4  ;;  %1451 = vmatprep.subr.mxu1 %v654_v25  ;;  %v652_v27 = vld [vmem:[%s2192_s2 + $0x60] sm:$0xff]  ;;  %v651_v28 = vld [vmem:[%s2192_s2 + $0x58] sm:$0xff]  ;;  %v650_v29 = vld [vmem:[%s2192_s2 + $0x50] sm:$0xff] }
  0x1d   : > { %1418 = vmatpush3.msra.mxu0 %v283_v4  ;;  %1452 = vmatpush3.msra.mxu1 %v654_v25  ;;  %v649_v30 = vld [vmem:[%s2192_s2 + $0x48] sm:$0xff]  ;;  %v648_v31 = vld [vmem:[%s2192_s2 + $0x40] sm:$0xff]  ;;  %v647_v32 = vld [vmem:[%s2192_s2 + $0x38] sm:$0xff]  ;;  %p1616_p3 = pnand %p1615_p2, %p1609_p13 }
  0x1e   : > { %1419 = vmatprep.subr.mxu0 %v282_v6  ;;  %1453 = vmatprep.subr.mxu1 %v653_v26  ;;  %v646_v33 = vld [vmem:[%s2192_s2 + $0x30] sm:$0xff]  ;;  %v645_v34 = vld [vmem:[%s2192_s2 + $0x28] sm:$0xff]  ;;  %v644_v35 = vld [vmem:[%s2192_s2 + $0x20] sm:$0xff] }
  0x1f   : > { %1420 = vmatpush3.msra.mxu0 %v282_v6  ;;  %1454 = vmatpush3.msra.mxu1 %v653_v26  ;;  %v643_v36 = vld [vmem:[%s2192_s2 + $0x18] sm:$0xff]  ;;  %v642_v37 = vld [vmem:[%s2192_s2 + $0x10] sm:$0xff]  ;;  %v641_v38 = vld [vmem:[%s2192_s2 + $0x8] sm:$0xff] }
  0x20   : > { %1421 = vmatprep.subr.mxu0 %v281_v7  ;;  %1455 = vmatprep.subr.mxu1 %v652_v27  ;;  %v640_v39 = vld [vmem:[%s2192_s2] sm:$0xff] }
  0x21   : > { %1422 = vmatpush3.msra.mxu0 %v281_v7  ;;  %1456 = vmatpush3.msra.mxu1 %v652_v27 }
  0x22   : > { %1423 = vmatprep.subr.mxu0 %v280_v8  ;;  %1457 = vmatprep.subr.mxu1 %v651_v28 }
  0x23   : > { %1424 = vmatpush3.msra.mxu0 %v280_v8  ;;  %1458 = vmatpush3.msra.mxu1 %v651_v28 }
  0x24   : > { %1426 = vmatmul.mubr.msk.f32.vlgmr.msra.gmra.mxu0 %vm288_vm0, %v200_v9  ;;  %1459 = vmatprep.subr.mxu1 %v650_v29 }
  0x25   : > { %1428 = vmatprep.mubr.msk.f32.mxu0 %vm288_vm0, %v201_v10  ;;  %1460 = vmatpush3.msra.mxu1 %v650_v29 }
  0x26   : > { %1461 = vmatprep.subr.mxu1 %v649_v30 }
  0x27   : > { %1462 = vmatpush3.msra.mxu1 %v649_v30 }
  0x28   : > { %1429 = vmatmul.mubr.msk.f32.gmra.mxu0 %vm288_vm0, %v202_v11  ;;  %1463 = vmatprep.subr.mxu1 %v648_v31 }
  0x29   : > { %1431 = vmatprep.mubr.msk.f32.mxu0 %vm288_vm0, %v203_v12  ;;  %1464 = vmatpush3.msra.mxu1 %v648_v31 }
  0x2a   : > { %1465 = vmatprep.subr.mxu1 %v647_v32 }
  0x2b   : > { %1466 = vmatpush3.msra.mxu1 %v647_v32 }
  0x2c   : > { %1432 = vmatmul.mubr.msk.f32.gmra.mxu0 %vm288_vm0, %v204_v13  ;;  %1467 = vmatprep.subr.mxu1 %v646_v33 }
  0x2d   : > { %1434 = vmatprep.mubr.msk.f32.mxu0 %vm288_vm0, %v205_v14  ;;  %1468 = vmatpush3.msra.mxu1 %v646_v33 }
  0x2e   : > { %1469 = vmatprep.subr.mxu1 %v645_v34 }
  0x2f   : > { %1470 = vmatpush3.msra.mxu1 %v645_v34 }
  0x30   : > { %1435 = vmatmul.mubr.msk.f32.gmra.mxu0 %vm288_vm0, %v206_v15  ;;  %1471 = vmatprep.subr.mxu1 %v644_v35 }
  0x31   : > { %1437 = vmatprep.mubr.msk.f32.mxu0 %vm288_vm0, %v207_v16  ;;  %1472 = vmatpush3.msra.mxu1 %v644_v35 }
  0x32   : > { %1473 = vmatprep.subr.mxu1 %v643_v36 }
  0x33   : > { %1474 = vmatpush3.msra.mxu1 %v643_v36 }
  0x34   : > { %1438 = vmatmul.mubr.msk.f32.gmra.mxu0 %vm288_vm0, %v208_v17  ;;  %1475 = vmatprep.subr.mxu1 %v642_v37 }
  0x35   : > { %1440 = vmatprep.mubr.msk.f32.mxu0 %vm288_vm0, %v209_v18  ;;  %1476 = vmatpush3.msra.mxu1 %v642_v37 }
  0x36   : > { %1477 = vmatprep.subr.mxu1 %v641_v38 }
  0x37   : > { %1478 = vmatpush3.msra.mxu1 %v641_v38 }
  0x38   : > { %1441 = vmatmul.mubr.msk.f32.gmra.mxu0 %vm288_vm0, %v210_v19  ;;  %1479 = vmatprep.subr.mxu1 %v640_v39 }
  0x39   : > { %1443 = vmatprep.mubr.msk.f32.mxu0 %vm288_vm0, %v211_v20  ;;  %1480 = vmatpush3.msra.mxu1 %v640_v39 }
  0x3c   : > { %1444 = vmatmul.mubr.msk.f32.gmra.mxu0 %vm288_vm0, %v212_v21 }
  0x3d   : > { %1446 = vmatprep.mubr.msk.f32.mxu0 %vm288_vm0, %v213_v22 }
  0x40   : > { %1447 = vmatmul.mubr.msk.f32.gmra.mxu0 %vm288_vm0, %v214_v23 }
  0xe4   : > { %v1427_v40 = vpop.f32.mrf.mxu0 }
  0xe5   : > { %v483_v42 = vmul.f32 0.0, %v1427_v40 }
  0xe6   : > { %v403_v41 = vpop.f32.mrf.mxu0 }
  0xe7   : > { %v498_v45 = vadd.f32 %v483_v42, %v403_v41 }
  0xe8   : > { %v1430_v43 = vpop.f32.mrf.mxu0 }
  0xe9   : > { %v485_v48 = vmul.f32 0.0, %v1430_v43 }
  0xea   : > { %v413_v44 = vpop.f32.mrf.mxu0 }
  0xeb   : > { %v484_v46 = vmul.f32 0.0, %v413_v44 }
  0xec   : > { %v1433_v47 = vpop.f32.mrf.mxu0 }
  0xed   : > { %v499_v49 = vadd.f32 %v498_v45, %v484_v46  ;;  %v487_v54 = vmul.f32 0.0, %v1433_v47 }
  0xee   : > { %v423_v50 = vpop.f32.mrf.mxu0 }
  0xef   : > { %v486_v51 = vmul.f32 0.0, %v423_v50  ;;  %v500_v52 = vadd.f32 %v499_v49, %v485_v48 }
  0xf0   : > { %v1436_v53 = vpop.f32.mrf.mxu0 }
  0xf1   : > { %v501_v55 = vadd.f32 %v500_v52, %v486_v51  ;;  %v489_v60 = vmul.f32 0.0, %v1436_v53 }
  0xf2   : > { %v433_v56 = vpop.f32.mrf.mxu0 }
  0xf3   : > { %v488_v57 = vmul.f32 0.0, %v433_v56  ;;  %v502_v58 = vadd.f32 %v501_v55, %v487_v54 }
  0xf4   : > { %v1439_v59 = vpop.f32.mrf.mxu0 }
  0xf5   : > { %v503_v61 = vadd.f32 %v502_v58, %v488_v57  ;;  %v491_v2 = vmul.f32 0.0, %v1439_v59 }
  0xf6   : > { %v443_v62 = vpop.f32.mrf.mxu0 }
  0xf7   : > { %v490_v63 = vmul.f32 0.0, %v443_v62  ;;  %v504_v0 = vadd.f32 %v503_v61, %v489_v60 }
  0xf8   : > { %v1442_v1 = vpop.f32.mrf.mxu0 }
  0xf9   : > { %v505_v3 = vadd.f32 %v504_v0, %v490_v63  ;;  %v493_v8 = vmul.f32 0.0, %v1442_v1 }
  0xfa   : > { %v453_v4 = vpop.f32.mrf.mxu0 }
  0xfb   : > { %v492_v5 = vmul.f32 0.0, %v453_v4  ;;  %v506_v6 = vadd.f32 %v505_v3, %v491_v2 }
  0xfc   : > { %v1445_v7 = vpop.f32.mrf.mxu0 }
  0xfd   : > { %v507_v9 = vadd.f32 %v506_v6, %v492_v5  ;;  %v495_v14 = vmul.f32 0.0, %v1445_v7 }
  0xfe   : > { %v463_v10 = vpop.f32.mrf.mxu0 }
  0xff   : > { %v494_v11 = vmul.f32 0.0, %v463_v10  ;;  %v508_v12 = vadd.f32 %v507_v9, %v493_v8 }
 0x100   : > { %v1854_v13 = vpop.f32.mrf.mxu0 }
 0x101   : > { %v509_v15 = vadd.f32 %v508_v12, %v494_v11  ;;  %v497_v19 = vmul.f32 0.0, %v1854_v13 }
 0x102   : > { %v473_v16 = vpop.f32.mrf.mxu0 }
 0x103   : > { %v496_v17 = vmul.f32 0.0, %v473_v16  ;;  %v510_v18 = vadd.f32 %v509_v15, %v495_v14 }
 0x105   : > { %v511_v20 = vadd.f32 %v510_v18, %v496_v17 }
 0x107   : > { %v512_v21 = vadd.f32 %v511_v20, %v497_v19 }
 0x109   : > { %v513_v22 = vrot.slane %v512_v21, 4 }
 0x10b   : > { %v514_v23 = vadd.f32 %v513_v22, %v512_v21 }
 0x10d   : > { %v515_v24 = vrot.slane %v514_v23, 2 }
 0x10f   : > { %v516_v25 = vadd.f32 %v515_v24, %v514_v23 }
 0x111   : > { %v517_v26 = vrot.slane %v516_v25, 1 }
 0x113   : > { %v518_v27 = vadd.f32 %v517_v26, %v516_v25 }
 0x115   : > { %v519_v28 = vmul.f32 0.125, %v518_v27 }
 0x117   : > { %v1857_v29 = vsub.f32 %v1427_v40, %v519_v28  ;;  %v1859_v30 = vsub.f32 %v413_v44, %v519_v28  ;;  %v1863_v32 = vsub.f32 %v403_v41, %v519_v28  ;;  %v1865_v33 = vsub.f32 %v1430_v43, %v519_v28 }
 0x118   : > { %v1867_v34 = vsub.f32 %v423_v50, %v519_v28  ;;  %v1871_v37 = vsub.f32 %v1433_v47, %v519_v28  ;;  %v1877_v40 = vsub.f32 %v433_v56, %v519_v28  ;;  %v1881_v44 = vsub.f32 %v1436_v53, %v519_v28 }
 0x119   : > { %v537_v31 = vmul.f32 %v1857_v29, %v1857_v29  ;;  %v538_v35 = vmul.f32 %v1859_v30, %v1859_v30  ;;  %v536_v38 = vmul.f32 %v1863_v32, %v1863_v32  ;;  %v539_v39 = vmul.f32 %v1865_v33, %v1865_v33 }
 0x11a   : > { %v540_v41 = vmul.f32 %v1867_v34, %v1867_v34  ;;  %v541_v45 = vmul.f32 %v1871_v37, %v1871_v37  ;;  %v1885_v48 = vsub.f32 %v443_v62, %v519_v28  ;;  %v542_v49 = vmul.f32 %v1877_v40, %v1877_v40 }
 0x11b   : > { %v553_v36 = vmul.f32 0.0, %v537_v31  ;;  %v554_v42 = vmul.f32 0.0, %v538_v35  ;;  %v555_v46 = vmul.f32 0.0, %v539_v39  ;;  %v1889_v52 = vsub.f32 %v1439_v59, %v519_v28 }
 0x11c   : > { %v556_v50 = vmul.f32 0.0, %v540_v41  ;;  %v543_v54 = vmul.f32 %v1881_v44, %v1881_v44  ;;  %v557_v55 = vmul.f32 0.0, %v541_v45  ;;  %v1893_v56 = vsub.f32 %v453_v4, %v519_v28 }
 0x11d   : > { %v568_v43 = vadd.f32 %v553_v36, %v536_v38  ;;  %v544_v57 = vmul.f32 %v1885_v48, %v1885_v48  ;;  %v558_v58 = vmul.f32 0.0, %v542_v49  ;;  %v1897_v61 = vsub.f32 %v1442_v1, %v519_v28 }
 0x11e   : > { %v545_v62 = vmul.f32 %v1889_v52, %v1889_v52  ;;  %v559_v63 = vmul.f32 0.0, %v543_v54  ;;  %v1901_v0 = vsub.f32 %v463_v10, %v519_v28  ;;  %v546_v2 = vmul.f32 %v1893_v56, %v1893_v56 }
 0x11f   : > { %v569_v47 = vadd.f32 %v568_v43, %v554_v42  ;;  %v560_v3 = vmul.f32 0.0, %v544_v57  ;;  %v1905_v5 = vsub.f32 %v1445_v7, %v519_v28  ;;  %v547_v6 = vmul.f32 %v1897_v61, %v1897_v61 }
 0x120   : > { %v561_v8 = vmul.f32 0.0, %v545_v62  ;;  %v1909_v9 = vsub.f32 %v473_v16, %v519_v28  ;;  %v548_v11 = vmul.f32 %v1901_v0, %v1901_v0  ;;  %v562_v12 = vmul.f32 0.0, %v546_v2 }
 0x121   : > { %v570_v51 = vadd.f32 %v569_v47, %v555_v46  ;;  %v1914_v14 = vsub.f32 %v1854_v13, %v519_v28  ;;  %v549_v15 = vmul.f32 %v1905_v5, %v1905_v5  ;;  %v563_v7 = vmul.f32 0.0, %v547_v6 }
 0x122   : > { %v550_v18 = vmul.f32 %v1909_v9, %v1909_v9  ;;  %v564_v19 = vmul.f32 0.0, %v548_v11 }
 0x123   : > { %v571_v53 = vadd.f32 %v570_v51, %v556_v50  ;;  %v551_v16 = vmul.f32 %v1914_v14, %v1914_v14  ;;  %v565_v21 = vmul.f32 0.0, %v549_v15 }
 0x124   : > { %v566_v23 = vmul.f32 0.0, %v550_v18 }
 0x125   : > { %v572_v60 = vadd.f32 %v571_v53, %v557_v55  ;;  %v567_v25 = vmul.f32 0.0, %v551_v16 }
 0x127   : > { %v573_v59 = vadd.f32 %v572_v60, %v558_v58 }
 0x129   : > { %v574_v4 = vadd.f32 %v573_v59, %v559_v63 }
 0x12b   : > { %v575_v1 = vadd.f32 %v574_v4, %v560_v3 }
 0x12d   : > { %v576_v10 = vadd.f32 %v575_v1, %v561_v8 }
 0x12f   : > { %v577_v17 = vadd.f32 %v576_v10, %v562_v12 }
 0x131   : > { %v578_v20 = vadd.f32 %v577_v17, %v563_v7 }
 0x133   : > { %v579_v22 = vadd.f32 %v578_v20, %v564_v19 }
 0x135   : > { %v580_v24 = vadd.f32 %v579_v22, %v565_v21 }
 0x137   : > { %v581_v13 = vadd.f32 %v580_v24, %v566_v23  ;;  %v996_v23 = vld [vmem:[%s2193_s3 + $0x28] sm:$0xff]  ;;  %v995_v24 = vld [vmem:[%s2193_s3 + $0x20] sm:$0xff] }
 0x139   : > { %v582_v26 = vadd.f32 %v581_v13, %v567_v25  ;;  %v994_v25 = vld [vmem:[%s2193_s3 + $0x18] sm:$0xff] }
 0x13b   : > { %v583_v27 = vrot.slane %v582_v26, 4 }
 0x13d   : > { %v584_v28 = vadd.f32 %v583_v27, %v582_v26  ;;  %v993_v27 = vld [vmem:[%s2193_s3 + $0x10] sm:$0xff] }
 0x13f   : > { %v585_v31 = vrot.slane %v584_v28, 2 }
 0x141   : > { %v586_v35 = vadd.f32 %v585_v31, %v584_v28  ;;  %v992_v28 = vld [vmem:[%s2193_s3 + $0x8] sm:$0xff] }
 0x143   : > { %v587_v36 = vrot.slane %v586_v35, 1 }
 0x145   : > { %v588_v38 = vadd.f32 %v587_v36, %v586_v35  ;;  %v991_v35 = vld [vmem:[%s2193_s3] sm:$0xff] }
 0x147   : > { %v589_v39 = vmul.f32 0.125, %v588_v38 }
 0x149   : > { %v590_v41 = vadd.f32 0.0001, %v589_v39 }
 0x14b   : > { %1602 = vrsqrt.f32 %v590_v41 }
 0x158   : > { %v1603_v42 = vpop.eup %1602 }
 0x159   : > { %v592_v43 = vmul.f32 %v1603_v42, %v1863_v32  ;;  %v593_v45 = vmul.f32 %v1603_v42, %v1857_v29  ;;  %v594_v46 = vmul.f32 %v1603_v42, %v1859_v30  ;;  %v595_v47 = vmul.f32 %v1603_v42, %v1865_v33 }
 0x15a   : > { %v596_v51 = vmul.f32 %v1603_v42, %v1867_v34  ;;  %v597_v58 = vmul.f32 %v1603_v42, %v1871_v37  ;;  %v598_v32 = vmul.f32 %v1603_v42, %v1877_v40  ;;  %v599_v33 = vmul.f32 %v1603_v42, %v1881_v44 }
 0x15b   : > { %v608_v49 = vmul.f32 0.01, %v592_v43  ;;  %v609_v50 = vmul.f32 0.01, %v593_v45  ;;  %v610_v54 = vmul.f32 0.01, %v594_v46  ;;  %v600_v34 = vmul.f32 %v1603_v42, %v1885_v48 }
 0x15c   : > { %v611_v57 = vmul.f32 0.01, %v595_v47  ;;  %v612_v62 = vmul.f32 0.01, %v596_v51  ;;  %v613_v30 = vmul.f32 0.01, %v597_v58  ;;  %v601_v37 = vmul.f32 %v1603_v42, %v1889_v52 }
 0x15d   : > { %v624_v55 = vmax.f32 %v592_v43, %v608_v49  ;;  %v625_v53 = vmax.f32 %v593_v45, %v609_v50  ;;  %v626_v60 = vmax.f32 %v594_v46, %v610_v54  ;;  %v614_v59 = vmul.f32 0.01, %v598_v32 }
 0x15e   : > { %v627_v29 = vmax.f32 %v595_v47, %v611_v57  ;;  %v628_v63 = vmax.f32 %v596_v51, %v612_v62  ;;  %v629_v2 = vmax.f32 %v597_v58, %v613_v30  ;;  %v615_v3 = vmul.f32 0.01, %v599_v33 }
 0x15f   : > { %1481 = vmatprep.mubr.f32.mxu1 %v624_v55  ;;  %v630_v4 = vmax.f32 %v598_v32, %v614_v59  ;;  %v616_v6 = vmul.f32 0.01, %v600_v34  ;;  %v602_v40 = vmul.f32 %v1603_v42, %v1893_v56  ;;  %v617_v1 = vmul.f32 0.01, %v601_v37 }
 0x160   : > { %1482 = vmatmul.mubr.f32.vlgmr.msra.gmra.mxu1 %v625_v53  ;;  %v631_v8 = vmax.f32 %v599_v33, %v615_v3  ;;  %v603_v44 = vmul.f32 %v1603_v42, %v1897_v61  ;;  %v604_v48 = vmul.f32 %v1603_v42, %v1901_v0  ;;  %v605_v52 = vmul.f32 %v1603_v42, %v1905_v5 }
 0x161   : > { %1484 = vmatprep.mubr.f32.mxu1 %v626_v60  ;;  %v632_v11 = vmax.f32 %v600_v34, %v616_v6  ;;  %v618_v12 = vmul.f32 0.01, %v602_v40  ;;  %v633_v10 = vmax.f32 %v601_v37, %v617_v1  ;;  %v606_v7 = vmul.f32 %v1603_v42, %v1909_v9  ;;  %v998_v9 = vld [vmem:[%s2193_s3 + $0x38] sm:$0xff] }
 0x162   : > { %v619_v15 = vmul.f32 0.01, %v603_v44  ;;  %v620_v56 = vmul.f32 0.01, %v604_v48  ;;  %v621_v19 = vmul.f32 0.01, %v605_v52  ;;  %v607_v61 = vmul.f32 %v1603_v42, %v1914_v14  ;;  %1505 = vmatprep.subr.mxu0 %v998_v9  ;;  %1545 = vmatprep.subr.mxu1 %v998_v9 }
 0x163   : > { %v634_v17 = vmax.f32 %v602_v40, %v618_v12  ;;  %v622_v20 = vmul.f32 0.01, %v606_v7  ;;  %1506 = vmatpush3.msra.mxu0 %v998_v9  ;;  %v997_v14 = vld [vmem:[%s2193_s3 + $0x30] sm:$0xff]  ;;  %1553 = vmatpush3.msra.mxu1 %v998_v9 }
 0x164   : > { %1485 = vmatmul.mubr.f32.gmra.mxu1 %v627_v29  ;;  %v635_v18 = vmax.f32 %v603_v44, %v619_v15  ;;  %v636_v16 = vmax.f32 %v604_v48, %v620_v56  ;;  %v637_v0 = vmax.f32 %v605_v52, %v621_v19  ;;  %v623_v21 = vmul.f32 0.01, %v607_v61  ;;  %1507 = vmatprep.subr.mxu0 %v997_v14 }
 0x165   : > { %1487 = vmatprep.mubr.f32.mxu1 %v628_v63  ;;  %v638_v22 = vmax.f32 %v606_v7, %v622_v20  ;;  %1546 = vmatprep.subr.mxu1 %v997_v14 }
 0x166   : > { %v639_v5 = vmax.f32 %v607_v61, %v623_v21  ;;  %1508 = vmatpush3.msra.mxu0 %v997_v14  ;;  %1554 = vmatpush3.msra.mxu1 %v997_v14 }
 0x167   : > { %1509 = vmatprep.subr.mxu0 %v996_v23  ;;  %1547 = vmatprep.subr.mxu1 %v996_v23 }
 0x168   : > { %1488 = vmatmul.mubr.f32.gmra.mxu1 %v629_v2  ;;  %1510 = vmatpush3.msra.mxu0 %v996_v23 }
 0x169   : > { %1490 = vmatprep.mubr.f32.mxu1 %v630_v4  ;;  %1555 = vmatpush3.msra.mxu1 %v996_v23 }
 0x16a   : > { %1511 = vmatprep.subr.mxu0 %v995_v24  ;;  %1548 = vmatprep.subr.mxu1 %v995_v24 }
 0x16b   : > { %1512 = vmatpush3.msra.mxu0 %v995_v24  ;;  %1556 = vmatpush3.msra.mxu1 %v995_v24 }
 0x16c   : > { %1491 = vmatmul.mubr.f32.gmra.mxu1 %v631_v8  ;;  %1513 = vmatprep.subr.mxu0 %v994_v25 }
 0x16d   : > { %1493 = vmatprep.mubr.f32.mxu1 %v632_v11  ;;  %1549 = vmatprep.subr.mxu1 %v994_v25 }
 0x16e   : > { %1514 = vmatpush3.msra.mxu0 %v994_v25  ;;  %1557 = vmatpush3.msra.mxu1 %v994_v25 }
 0x16f   : > { %1515 = vmatprep.subr.mxu0 %v993_v27  ;;  %1550 = vmatprep.subr.mxu1 %v993_v27 }
 0x170   : > { %1494 = vmatmul.mubr.f32.gmra.mxu1 %v633_v10  ;;  %1516 = vmatpush3.msra.mxu0 %v993_v27 }
 0x171   : > { %1496 = vmatprep.mubr.f32.mxu1 %v634_v17  ;;  %1558 = vmatpush3.msra.mxu1 %v993_v27 }
 0x172   : > { %1517 = vmatprep.subr.mxu0 %v992_v28  ;;  %1551 = vmatprep.subr.mxu1 %v992_v28 }
 0x173   : > { %1518 = vmatpush3.msra.mxu0 %v992_v28  ;;  %1559 = vmatpush3.msra.mxu1 %v992_v28 }
 0x174   : > { %1497 = vmatmul.mubr.f32.gmra.mxu1 %v635_v18  ;;  %1519 = vmatprep.subr.mxu0 %v991_v35 }
 0x175   : > { %1499 = vmatprep.mubr.f32.mxu1 %v636_v16  ;;  %1552 = vmatprep.subr.mxu1 %v991_v35 }
 0x176   : > { %1520 = vmatpush3.msra.mxu0 %v991_v35  ;;  %1560 = vmatpush3.msra.mxu1 %v991_v35 }
 0x178   : > { %1500 = vmatmul.mubr.f32.gmra.mxu1 %v637_v0 }
 0x179   : > { %1502 = vmatprep.mubr.f32.mxu1 %v638_v22 }
 0x17c   : > { %1503 = vmatmul.mubr.f32.gmra.mxu1 %v639_v5 }
 0x220   : > { %v1953_v13 = vpop.f32.mrf.mxu1 }
 0x221   : > { %v802_v26 = vmul.f32 0.0, %v1953_v13 }
 0x222   : > { %v1962_v31 = vpop.f32.mrf.mxu1 }
 0x223   : > { %v817_v38 = vsel %vm288_vm0, %v1962_v31, 0.0  ;;  %v818_v39 = vsel %vm288_vm0, %v802_v26, 0.0 }
 0x224   : > { %v1967_v36 = vpop.f32.mrf.mxu1  ;;  %v819_v45 = vadd.f32 %v818_v39, %v817_v38 }
 0x225   : > { %v804_v42 = vmul.f32 0.0, %v1967_v36 }
 0x226   : > { %v1972_v41 = vpop.f32.mrf.mxu1 }
 0x227   : > { %v803_v43 = vmul.f32 0.0, %v1972_v41  ;;  %v822_v51 = vsel %vm288_vm0, %v804_v42, 0.0 }
 0x228   : > { %v1976_v46 = vpop.f32.mrf.mxu1 }
 0x229   : > { %v820_v47 = vsel %vm288_vm0, %v803_v43, 0.0  ;;  %v806_v54 = vmul.f32 0.0, %v1976_v46 }
 0x22a   : > { %v821_v49 = vadd.f32 %v820_v47, %v819_v45  ;;  %v742_v50 = vpop.f32.mrf.mxu1 }
 0x22b   : > { %v805_v55 = vmul.f32 0.0, %v742_v50  ;;  %v826_v32 = vsel %vm288_vm0, %v806_v54, 0.0 }
 0x22c   : > { %v823_v53 = vadd.f32 %v822_v51, %v821_v49  ;;  %v1981_v57 = vpop.f32.mrf.mxu1 }
 0x22d   : > { %v824_v58 = vsel %vm288_vm0, %v805_v55, 0.0  ;;  %v808_v29 = vmul.f32 0.0, %v1981_v57 }
 0x22e   : > { %v825_v60 = vadd.f32 %v824_v58, %v823_v53  ;;  %v752_v62 = vpop.f32.mrf.mxu1 }
 0x22f   : > { %v807_v30 = vmul.f32 0.0, %v752_v62  ;;  %v830_v3 = vsel %vm288_vm0, %v808_v29, 0.0 }
 0x230   : > { %v827_v33 = vadd.f32 %v826_v32, %v825_v60  ;;  %v1986_v63 = vpop.f32.mrf.mxu1 }
 0x231   : > { %v828_v59 = vsel %vm288_vm0, %v807_v30, 0.0  ;;  %v810_v37 = vmul.f32 0.0, %v1986_v63 }
 0x232   : > { %v829_v34 = vadd.f32 %v828_v59, %v827_v33  ;;  %v762_v2 = vpop.f32.mrf.mxu1 }
 0x233   : > { %v809_v4 = vmul.f32 0.0, %v762_v2  ;;  %v834_v11 = vsel %vm288_vm0, %v810_v37, 0.0 }
 0x234   : > { %v831_v6 = vadd.f32 %v830_v3, %v829_v34  ;;  %v1991_v40 = vpop.f32.mrf.mxu1 }
 0x235   : > { %v832_v8 = vsel %vm288_vm0, %v809_v4, 0.0  ;;  %v812_v12 = vmul.f32 0.0, %v1991_v40 }
 0x236   : > { %v833_v1 = vadd.f32 %v832_v8, %v831_v6  ;;  %v772_v44 = vpop.f32.mrf.mxu1 }
 0x237   : > { %v811_v48 = vmul.f32 0.0, %v772_v44  ;;  %v838_v56 = vsel %vm288_vm0, %v812_v12, 0.0 }
 0x238   : > { %v835_v10 = vadd.f32 %v834_v11, %v833_v1  ;;  %v1996_v15 = vpop.f32.mrf.mxu1 }
 0x239   : > { %v836_v52 = vsel %vm288_vm0, %v811_v48, 0.0  ;;  %v814_v18 = vmul.f32 0.0, %v1996_v15 }
 0x23a   : > { %v837_v7 = vadd.f32 %v836_v52, %v835_v10  ;;  %v1999_v17 = vpop.f32.mrf.mxu1 }
 0x23b   : > { %v813_v19 = vmul.f32 0.0, %v1999_v17  ;;  %v842_v22 = vsel %vm288_vm0, %v814_v18, 0.0 }
 0x23c   : > { %v839_v61 = vadd.f32 %v838_v56, %v837_v7  ;;  %v2004_v20 = vpop.f32.mrf.mxu1 }
 0x23d   : > { %v840_v16 = vsel %vm288_vm0, %v813_v19, 0.0  ;;  %v816_v5 = vmul.f32 0.0, %v2004_v20 }
 0x23e   : > { %v841_v0 = vadd.f32 %v840_v16, %v839_v61  ;;  %v2007_v21 = vpop.f32.mrf.mxu1 }
 0x23f   : > { %v815_v9 = vmul.f32 0.0, %v2007_v21  ;;  %v846_v25 = vsel %vm288_vm0, %v816_v5, 0.0 }
 0x240   : > { %v843_v14 = vadd.f32 %v842_v22, %v841_v0 }
 0x241   : > { %v844_v23 = vsel %vm288_vm0, %v815_v9, 0.0 }
 0x242   : > { %v845_v24 = vadd.f32 %v844_v23, %v843_v14 }
 0x244   : > { %v847_v26 = vadd.f32 %v846_v25, %v845_v24 }
 0x246   : > { %v848_v27 = vrot.slane %v847_v26, 4 }
 0x248   : > { %v849_v28 = vadd.f32 %v848_v27, %v847_v26 }
 0x24a   : > { %v850_v35 = vrot.slane %v849_v28, 2 }
 0x24c   : > { %v851_v38 = vadd.f32 %v850_v35, %v849_v28 }
 0x24e   : > { %v852_v39 = vrot.slane %v851_v38, 1 }
 0x250   : > { %v853_v42 = vadd.f32 %v852_v39, %v851_v38 }
 0x252   : > { %v854_v43 = vmul.f32 0.125, %v853_v42 }
 0x254   : > { %v2015_v45 = vsub.f32 %v1953_v13, %v854_v43  ;;  %v2018_v47 = vsub.f32 %v1972_v41, %v854_v43  ;;  %v2021_v49 = vsub.f32 %v1962_v31, %v854_v43  ;;  %v2024_v51 = vsub.f32 %v1967_v36, %v854_v43 }
 0x255   : > { %v2028_v55 = vsub.f32 %v742_v50, %v854_v43  ;;  %v2033_v13 = vsub.f32 %v1976_v46, %v854_v43  ;;  %v2039_v36 = vsub.f32 %v752_v62, %v854_v43  ;;  %v2044_v32 = vsub.f32 %v1981_v57, %v854_v43 }
 0x256   : > { %v872_v54 = vmul.f32 %v2015_v45, %v2015_v45  ;;  %v873_v53 = vmul.f32 %v2018_v47, %v2018_v47  ;;  %v871_v41 = vmul.f32 %v2021_v49, %v2021_v49  ;;  %v874_v31 = vmul.f32 %v2024_v51, %v2024_v51 }
 0x257   : > { %v875_v60 = vmul.f32 %v2028_v55, %v2028_v55  ;;  %v876_v46 = vmul.f32 %v2033_v13, %v2033_v13  ;;  %v2050_v34 = vsub.f32 %v762_v2, %v854_v43  ;;  %v877_v62 = vmul.f32 %v2039_v36, %v2039_v36 }
 0x258   : > { %v888_v58 = vmul.f32 0.0, %v872_v54  ;;  %v889_v50 = vmul.f32 0.0, %v873_v53  ;;  %v890_v29 = vmul.f32 0.0, %v874_v31  ;;  %v903_v30 = vsel %vm288_vm0, %v871_v41, 0.0 }
 0x259   : > { %v891_v3 = vmul.f32 0.0, %v875_v60  ;;  %v2056_v57 = vsub.f32 %v1986_v63, %v854_v43  ;;  %v878_v6 = vmul.f32 %v2044_v32, %v2044_v32  ;;  %v892_v8 = vmul.f32 0.0, %v876_v46 }
 0x25a   : > { %v904_v33 = vsel %vm288_vm0, %v888_v58, 0.0  ;;  %v906_v37 = vsel %vm288_vm0, %v889_v50, 0.0  ;;  %v908_v1 = vsel %vm288_vm0, %v890_v29, 0.0  ;;  %v2061_v12 = vsub.f32 %v772_v44, %v854_v43 }
 0x25b   : > { %v905_v59 = vadd.f32 %v904_v33, %v903_v30  ;;  %v879_v2 = vmul.f32 %v2050_v34, %v2050_v34  ;;  %v893_v48 = vmul.f32 0.0, %v877_v62  ;;  %v910_v10 = vsel %vm288_vm0, %v891_v3, 0.0 }
 0x25c   : > { %v2067_v7 = vsub.f32 %v1991_v40, %v854_v43  ;;  %v880_v63 = vmul.f32 %v2056_v57, %v2056_v57  ;;  %v894_v56 = vmul.f32 0.0, %v878_v6  ;;  %v912_v18 = vsel %vm288_vm0, %v892_v8, 0.0 }
 0x25d   : > { %v907_v4 = vadd.f32 %v906_v37, %v905_v59  ;;  %v867_v44 = vsub.f32 %v1999_v17, %v854_v43  ;;  %v881_v61 = vmul.f32 %v2061_v12, %v2061_v12  ;;  %v895_v16 = vmul.f32 0.0, %v879_v2 }
 0x25e   : > { %v914_v0 = vsel %vm288_vm0, %v893_v48, 0.0  ;;  %v868_v5 = vsub.f32 %v1996_v15, %v854_v43  ;;  %v882_v40 = vmul.f32 %v2067_v7, %v2067_v7  ;;  %v896_v9 = vmul.f32 0.0, %v880_v63 }
 0x25f   : > { %v909_v11 = vadd.f32 %v908_v1, %v907_v4  ;;  %v916_v14 = vsel %vm288_vm0, %v894_v56, 0.0  ;;  %v869_v24 = vsub.f32 %v2007_v21, %v854_v43  ;;  %v883_v25 = vmul.f32 %v867_v44, %v867_v44 }
 0x260   : > { %v897_v17 = vmul.f32 0.0, %v881_v61  ;;  %v918_v26 = vsel %vm288_vm0, %v895_v16, 0.0  ;;  %v870_v28 = vsub.f32 %v2004_v20, %v854_v43  ;;  %v884_v35 = vmul.f32 %v868_v5, %v868_v5 }
 0x261   : > { %v911_v52 = vadd.f32 %v910_v10, %v909_v11  ;;  %v898_v38 = vmul.f32 0.0, %v882_v40  ;;  %v920_v15 = vsel %vm288_vm0, %v896_v9, 0.0  ;;  %v885_v42 = vmul.f32 %v869_v24, %v869_v24 }
 0x262   : > { %v899_v54 = vmul.f32 0.0, %v883_v25  ;;  %v922_v53 = vsel %vm288_vm0, %v897_v17, 0.0  ;;  %v886_v31 = vmul.f32 %v870_v28, %v870_v28  ;;  %v900_v58 = vmul.f32 0.0, %v884_v35 }
 0x263   : > { %v913_v19 = vadd.f32 %v912_v18, %v911_v52  ;;  %v924_v21 = vsel %vm288_vm0, %v898_v38, 0.0  ;;  %v901_v50 = vmul.f32 0.0, %v885_v42 }
 0x264   : > { %v926_v46 = vsel %vm288_vm0, %v899_v54, 0.0  ;;  %v902_v20 = vmul.f32 0.0, %v886_v31  ;;  %v928_v43 = vsel %vm288_vm0, %v900_v58, 0.0 }
 0x265   : > { %v915_v22 = vadd.f32 %v914_v0, %v913_v19  ;;  %v930_v33 = vsel %vm288_vm0, %v901_v50, 0.0 }
 0x266   : > { %v932_v62 = vsel %vm288_vm0, %v902_v20, 0.0 }
 0x267   : > { %v917_v23 = vadd.f32 %v916_v14, %v915_v22 }
 0x269   : > { %v919_v27 = vadd.f32 %v918_v26, %v917_v23 }
 0x26b   : > { %v921_v39 = vadd.f32 %v920_v15, %v919_v27 }
 0x26d   : > { %v923_v41 = vadd.f32 %v922_v53, %v921_v39 }
 0x26f   : > { %v925_v60 = vadd.f32 %v924_v21, %v923_v41 }
 0x271   : > { %v927_v29 = vadd.f32 %v926_v46, %v925_v60 }
 0x273   : > { %v929_v30 = vadd.f32 %v928_v43, %v927_v29 }
 0x275   : > { %v931_v59 = vadd.f32 %v930_v33, %v929_v30 }
 0x277   : > { %v933_v3 = vadd.f32 %v932_v62, %v931_v59 }
 0x279   : > { %v934_v37 = vrot.slane %v933_v3, 4 }
 0x27b   : > { %v935_v4 = vadd.f32 %v934_v37, %v933_v3 }
 0x27d   : > { %v936_v6 = vrot.slane %v935_v4, 2 }
 0x27f   : > { %v937_v8 = vadd.f32 %v936_v6, %v935_v4 }
 0x281   : > { %v938_v1 = vrot.slane %v937_v8, 1 }
 0x283   : > { %v939_v11 = vadd.f32 %v938_v1, %v937_v8 }
 0x285   : > { %v940_v2 = vmul.f32 0.125, %v939_v11 }
 0x287   : > { %v941_v48 = vadd.f32 0.0001, %v940_v2 }
 0x289   : > { %1604 = vrsqrt.f32 %v941_v48 }
 0x296   : > { %v1605_v10 = vpop.eup %1604 }
 0x297   : > { %v956_v52 = vmul.f32 %v1605_v10, %v868_v5  ;;  %v957_v63 = vmul.f32 %v1605_v10, %v869_v24  ;;  %v943_v56 = vmul.f32 %v1605_v10, %v2021_v49  ;;  %v955_v18 = vmul.f32 %v1605_v10, %v867_v44 }
 0x298   : > { %v944_v19 = vmul.f32 %v1605_v10, %v2015_v45  ;;  %v945_v61 = vmul.f32 %v1605_v10, %v2018_v47  ;;  %v946_v16 = vmul.f32 %v1605_v10, %v2024_v51  ;;  %v958_v0 = vmul.f32 %v1605_v10, %v870_v28 }
 0x299   : > { %v972_v22 = vmul.f32 0.01, %v956_v52  ;;  %v973_v40 = vmul.f32 0.01, %v957_v63  ;;  %v959_v9 = vmul.f32 0.01, %v943_v56  ;;  %v947_v14 = vmul.f32 %v1605_v10, %v2028_v55 }
 0x29a   : > { %v971_v23 = vmul.f32 0.01, %v955_v18  ;;  %v960_v25 = vmul.f32 0.01, %v944_v19  ;;  %v961_v17 = vmul.f32 0.01, %v945_v61  ;;  %v948_v45 = vmul.f32 %v1605_v10, %v2033_v13 }
 0x29b   : > { %v975_v5 = vmax.f32 %v943_v56, %v959_v9  ;;  %v988_v24 = vmax.f32 %v956_v52, %v972_v22  ;;  %v962_v44 = vmul.f32 0.01, %v946_v16  ;;  %v974_v51 = vmul.f32 0.01, %v958_v0 }
 0x29c   : > { %v987_v26 = vmax.f32 %v955_v18, %v971_v23  ;;  %v976_v49 = vmax.f32 %v944_v19, %v960_v25  ;;  %v977_v47 = vmax.f32 %v945_v61, %v961_v17  ;;  %v963_v27 = vmul.f32 0.01, %v947_v14 }
 0x29d   : > { %1521 = vmatprep.mubr.msk.f32.mxu0 %vm288_vm0, %v975_v5  ;;  %v949_v28 = vmul.f32 %v1605_v10, %v2039_v36  ;;  %v989_v35 = vmax.f32 %v957_v63, %v973_v40  ;;  %v978_v55 = vmax.f32 %v946_v16, %v962_v44  ;;  %v964_v13 = vmul.f32 0.01, %v948_v45 }
 0x29e   : > { %1539 = vmatprep.mubr.msk.f32.mxu1 %vm288_vm0, %v987_v26  ;;  %1522 = vmatmul.mubr.msk.f32.vlgmr.msra.gmra.mxu0 %vm288_vm0, %v976_v49  ;;  %v950_v38 = vmul.f32 %v1605_v10, %v2044_v32  ;;  %v990_v15 = vmax.f32 %v958_v0, %v974_v51  ;;  %v979_v39 = vmax.f32 %v947_v14, %v963_v27 }
 0x29f   : > { %1540 = vmatmul.mubr.msk.f32.vlgmr.msra.gmra.mxu1 %vm288_vm0, %v988_v24  ;;  %1524 = vmatprep.mubr.msk.f32.mxu0 %vm288_vm0, %v977_v47  ;;  %v965_v42 = vmul.f32 0.01, %v949_v28  ;;  %v951_v36 = vmul.f32 %v1605_v10, %v2050_v34  ;;  %v980_v54 = vmax.f32 %v948_v45, %v964_v13  ;;  %v952_v41 = vmul.f32 %v1605_v10, %v2056_v57 }
 0x2a0   : > { %1542 = vmatprep.mubr.msk.f32.mxu1 %vm288_vm0, %v989_v35  ;;  %v966_v53 = vmul.f32 0.01, %v950_v38  ;;  %v953_v21 = vmul.f32 %v1605_v10, %v2061_v12  ;;  %v954_v60 = vmul.f32 %v1605_v10, %v2067_v7 }
 0x2a1   : > { %v981_v31 = vmax.f32 %v949_v28, %v965_v42  ;;  %v967_v58 = vmul.f32 0.01, %v951_v36  ;;  %v968_v34 = vmul.f32 0.01, %v952_v41 }
 0x2a2   : > { %1525 = vmatmul.mubr.msk.f32.gmra.mxu0 %vm288_vm0, %v978_v55  ;;  %v982_v32 = vmax.f32 %v950_v38, %v966_v53  ;;  %v969_v46 = vmul.f32 0.01, %v953_v21  ;;  %v970_v29 = vmul.f32 0.01, %v954_v60 }
 0x2a3   : > { %1543 = vmatmul.mubr.msk.f32.gmra.mxu1 %vm288_vm0, %v990_v15  ;;  %1527 = vmatprep.mubr.msk.f32.mxu0 %vm288_vm0, %v979_v39  ;;  %v983_v50 = vmax.f32 %v951_v36, %v967_v58  ;;  %v984_v57 = vmax.f32 %v952_v41, %v968_v34 }
 0x2a4   : > { %v985_v20 = vmax.f32 %v953_v21, %v969_v46  ;;  %v986_v12 = vmax.f32 %v954_v60, %v970_v29 }
 0x2a6   : > { %1528 = vmatmul.mubr.msk.f32.gmra.mxu0 %vm288_vm0, %v980_v54 }
 0x2a7   : > { %1530 = vmatprep.mubr.msk.f32.mxu0 %vm288_vm0, %v981_v31 }
 0x2aa   : > { %1531 = vmatmul.mubr.msk.f32.gmra.mxu0 %vm288_vm0, %v982_v32 }
 0x2ab   : > { %1533 = vmatprep.mubr.msk.f32.mxu0 %vm288_vm0, %v983_v50 }
 0x2ae   : > { %1534 = vmatmul.mubr.msk.f32.gmra.mxu0 %vm288_vm0, %v984_v57 }
 0x2af   : > { %1536 = vmatprep.mubr.msk.f32.mxu0 %vm288_vm0, %v985_v20 }
 0x2b2   : > { %1537 = vmatmul.mubr.msk.f32.gmra.mxu0 %vm288_vm0, %v986_v12 }
 0x35e   : > { %v1523_v7 = vpop.f32.mrf.mxu0 }
 0x35f   : > { %1193 = vst [vmem:[%s2121_s30 + $0x8] sm:$0xff] %v1523_v7  ;;  %v1541_v43 = vpop.f32.mrf.mxu1 }
 0x360   : > { %1205 = vst [vmem:[%s2121_s30 + $0x68] sm:$0xff] %v1541_v43  ;;  %v1113_v30 = vpop.f32.mrf.mxu0 }
 0x361   : > { %1192 = vst [vmem:[%s2121_s30] sm:$0xff] %v1113_v30  ;;  %v1173_v33 = vpop.f32.mrf.mxu1 }
 0x362   : > { %1204 = vst [vmem:[%s2121_s30 + $0x60] sm:$0xff] %v1173_v33  ;;  %v1526_v59 = vpop.f32.mrf.mxu0 }
 0x363   : > { %1195 = vst [vmem:[%s2121_s30 + $0x18] sm:$0xff] %v1526_v59  ;;  %v1544_v62 = vpop.f32.mrf.mxu1 }
 0x364   : > { %1207 = vst [vmem:[%s2121_s30 + $0x78] sm:$0xff] %v1544_v62  ;;  %v1123_v3 = vpop.f32.mrf.mxu0 }
 0x365   : > { %1194 = vst [vmem:[%s2121_s30 + $0x10] sm:$0xff] %v1123_v3  ;;  %v1183_v37 = vpop.f32.mrf.mxu1 }
 0x366   : > { %1206 = vst [vmem:[%s2121_s30 + $0x70] sm:$0xff] %v1183_v37  ;;  %v1529_v4 = vpop.f32.mrf.mxu0 }
 0x367   : > { %1197 = vst [vmem:[%s2121_s30 + $0x28] sm:$0xff] %v1529_v4 }
 0x368   : > { %v1133_v6 = vpop.f32.mrf.mxu0 }
 0x369   : > { %1196 = vst [vmem:[%s2121_s30 + $0x20] sm:$0xff] %v1133_v6 }
 0x36a   : > { %v1532_v8 = vpop.f32.mrf.mxu0 }
 0x36b   : > { %1199 = vst [vmem:[%s2121_s30 + $0x38] sm:$0xff] %v1532_v8 }
 0x36c   : > { %v1143_v1 = vpop.f32.mrf.mxu0 }
 0x36d   : > { %1198 = vst [vmem:[%s2121_s30 + $0x30] sm:$0xff] %v1143_v1 }
 0x36e   : > { %v1535_v11 = vpop.f32.mrf.mxu0 }
 0x36f   : > { %1201 = vst [vmem:[%s2121_s30 + $0x48] sm:$0xff] %v1535_v11 }
 0x370   : > { %v1153_v2 = vpop.f32.mrf.mxu0 }
 0x371   : > { %1200 = vst [vmem:[%s2121_s30 + $0x40] sm:$0xff] %v1153_v2 }
 0x372   : > { %v1538_v48 = vpop.f32.mrf.mxu0 }
 0x373   : > { %1203 = vst [vmem:[%s2121_s30 + $0x58] sm:$0xff] %v1538_v48 }
 0x374   : > { %v1163_v10 = vpop.f32.mrf.mxu0 }
 0x375   : > { %1202 = vst [vmem:[%s2121_s30 + $0x50] sm:$0xff] %v1163_v10 }
 0x376   : > { %1619 = shalt.err (!%p1616_p3)
}
 0x377   : > { %s1620_s14 = scalar_lea.hbm %s2142_s9, 2048  ;;  %s1624_s23 = scalar_lea.hbm %s2194_s4, 8192 }
 0x378   : > { %p1621_p4 = scmp.ne.s32.totalorder %s2142_s9, %s1620_s14  ;;  %p1625_p9 = scmp.lt.s32.totalorder %s2142_s9, %s2194_s4 }
 0x379   : > { %p1626_p10 = scmp.lt.s32.totalorder %s1624_s23, %s1620_s14 }
 0x37a   : > { %p1622_p7 = pnand %p1621_p4, %p1734_p5 }
 0x37b   : > { %p1627_p11 = por %p1626_p10, %p1625_p9 }
 0x37c   : > { %p1623_p8 = pneg %p1622_p7 }
 0x37e   : > { %p1628_p12 = pnand %p1627_p11, %p1623_p8 }
 0x380   : > { %1631 = shalt.err (!%p1628_p12)
}
 0x381   : > { %s1669_s29 = smov 128   ;;  %s1670_s30 = smov 8  }
 0x382   : > { %1561 = dma.vmem_to_hbm [thread:$0]  (%p1734_p5), %s2144_s6, 2048, %s2142_s9, %s2150_s10, %s1669_s29, %s1669_s29, %s1670_s30  }
 0x383 PF: > { %p1567_p13 = scmp.ge.s32.totalorder %s1666_s18, 2  ;;  %s1237_s5 = sand.u32 1, %s1654_s15  }
 0x384   : > { %s1238_s7 = scalar_lea.sflag [#allocation3], %s1237_s5 }
 0x385   : > { %p1564_p0 = pnand %p1567_p13, %p1738_p6 }
 0x387   : > { %p1565_p1 = pneg %p1564_p0 }
 0x389   : > { %1649 = dma.done.wait (%p1565_p1), %s1238_s7, 2048  }
 0x38a   : > { %1651 = vsyncadd (%p1565_p1), %s1238_s7, 4294965248  ;;  %p14_p2 = scmp.ge.s32.totalorder %s1721_s21, 6   ;;  %s2197_s15 = smov %s1658_s16 }
 0x38b   : > { %s2198_s16 = smov %s1662_s17  ;;  %s2199_s17 = smov %s1732_s24 }
 0x38c   : > { %s2200_s18 = smov %s1721_s21  ;;  %16 = sbr.rel (!%p14_p2) target bundleno = 3 (0x3), region = 71 }
 0x391   :  { %1243 = vsyncpa [#allocation3], 1 }
 0x392   :  { %1245 = vsyncpa [#allocation3 + $0x1], 1 }

</bundles_post_ra>
